<compile_context>
chip_gen: v6e
topology: v6e:2x2x1
jax: 0.10.0
libtpu: 0.0.40
codegen_flags: <defaults>
</compile_context>

<pallas_src>
from functools import partial

import jax
import jax.numpy as jnp
import numpy as np
from jax.experimental import pallas as pl
from jax.experimental.pallas import tpu as pltpu

_LANES = 128


def _cdiv(a, b):
    return (a + b - 1) // b


def _round_up(a, b):
    return _cdiv(a, b) * b


def _vae_loss_kernel(mu_ref, logvar_ref,
                     rend_col_ref, targ_col_ref,
                     rend_sil_ref, targ_sil_ref,
                     loss_ref, recon_ref, kld_ref,
                     col_acc, sil_acc,
                     *, kld_coef, recon_coef, batch_size,
                     clamp, clamp_threshold, n_col, n_sil):
    step = pl.program_id(0)

    @pl.when(step == 0)
    def _init():
        col_acc[...] = jnp.zeros_like(col_acc)
        sil_acc[...] = jnp.zeros_like(sil_acc)

    # Streaming squared-error partial sums.  Only a sublane reduction per
    # block; the cross-lane (XLU) reduce is deferred to the finalize step.
    d_col = (targ_col_ref[...].astype(jnp.float32)
             - rend_col_ref[...].astype(jnp.float32))
    col_acc[...] += jnp.sum(d_col * d_col, axis=0, keepdims=True)

    d_sil = (targ_sil_ref[...].astype(jnp.float32)
             - rend_sil_ref[...].astype(jnp.float32))
    sil_acc[...] += jnp.sum(d_sil * d_sil, axis=0, keepdims=True)

    @pl.when(step == pl.num_programs(0) - 1)
    def _finalize():
        # |x^2| == x^2, so the torch .abs() is dropped.
        col_err = jnp.sum(col_acc[...]) / n_col
        sil_err = jnp.sum(sil_acc[...]) / n_sil
        reconstruction_err = (col_err + sil_err) * 0.5

        mu = mu_ref[...].astype(jnp.float32)
        lv = logvar_ref[...].astype(jnp.float32)
        kld = -0.5 * jnp.mean(1.0 + lv - mu * mu - jnp.exp(lv))

        loss = recon_coef * reconstruction_err + kld_coef * kld
        # (perceptual-loss branch skipped, see TODO above)
        loss = loss / batch_size
        if clamp:
            loss = jnp.clip(loss, -clamp_threshold, clamp_threshold)

        loss_ref[0] = loss
        recon_ref[0] = reconstruction_err
        kld_ref[0] = kld


def _flatten_pad(x, total_rows):
    """Flatten to 1-D, zero-pad to total_rows*128 elements, reshape lane-dense."""
    flat = x.reshape(-1)
    pad = total_rows * _LANES - flat.size
    if pad:
        flat = jnp.concatenate([flat, jnp.zeros((pad,), flat.dtype)])
    return flat.reshape(total_rows, _LANES)


def vae_loss(mu, logvar,
             rendered_images, rendered_silhouttes,
             target_renders, target_silhouttes,
             batch_size, *,
             KLD_coef=1.0, reconstruction_coef=1.0,
             clamp=True, clamp_threshold=100.0,
             max_block_rows=2048):
    """Returns (loss, reconstruction_err, KL_divergence) as f32 scalars."""
    n_col = rendered_images.size
    n_sil = rendered_silhouttes.size
    assert target_renders.size == n_col and target_silhouttes.size == n_sil

    # Tile/grid geometry: grid derived from the color stream; silhouette block
    # rows sized proportionally (C x smaller) over the same grid.
    rows_col = _cdiv(n_col, _LANES)
    blk_col = min(int(max_block_rows), _round_up(rows_col, 8))
    grid = _cdiv(rows_col, blk_col)
    rows_sil = _cdiv(n_sil, _LANES)
    blk_sil = max(8, _round_up(_cdiv(rows_sil, grid), 8))

    # Native-dtype, lane-dense slabs (zero padding on both rendered & target
    # so padded rows contribute nothing to the squared-error sums).
    rc = _flatten_pad(rendered_images, grid * blk_col)
    tc = _flatten_pad(target_renders, grid * blk_col)
    rs = _flatten_pad(rendered_silhouttes, grid * blk_sil)
    ts = _flatten_pad(target_silhouttes, grid * blk_sil)

    B, Z = mu.shape

    kernel = partial(
        _vae_loss_kernel,
        kld_coef=float(KLD_coef),
        recon_coef=float(reconstruction_coef),
        batch_size=float(batch_size),
        clamp=bool(clamp),
        clamp_threshold=float(clamp_threshold),
        n_col=float(n_col),
        n_sil=float(n_sil),
    )

    smem_out = pl.BlockSpec((1,), lambda i: (0,),
                            memory_space=pltpu.MemorySpace.SMEM)

    grid_spec = pltpu.PrefetchScalarGridSpec(
        num_scalar_prefetch=0,
        grid=(grid,),
        in_specs=[
            pl.BlockSpec((B, Z), lambda i: (0, 0)),          # mu (resident)
            pl.BlockSpec((B, Z), lambda i: (0, 0)),          # logvar (resident)
            pl.BlockSpec((blk_col, _LANES), lambda i: (i, 0)),  # rendered color
            pl.BlockSpec((blk_col, _LANES), lambda i: (i, 0)),  # target color
            pl.BlockSpec((blk_sil, _LANES), lambda i: (i, 0)),  # rendered sil
            pl.BlockSpec((blk_sil, _LANES), lambda i: (i, 0)),  # target sil
        ],
        out_specs=(smem_out, smem_out, smem_out),
        scratch_shapes=[
            pltpu.VMEM((1, _LANES), jnp.float32),   # color partial sums (per lane)
            pltpu.VMEM((1, _LANES), jnp.float32),   # silhouette partial sums
        ],
    )

    loss, recon, kld = pl.pallas_call(
        kernel,
        out_shape=(
            jax.ShapeDtypeStruct((1,), jnp.float32),
            jax.ShapeDtypeStruct((1,), jnp.float32),
            jax.ShapeDtypeStruct((1,), jnp.float32),
        ),
        grid_spec=grid_spec,
        compiler_params=pltpu.CompilerParams(
            dimension_semantics=("arbitrary",)),
    )(mu, logvar, rc, tc, rs, ts)
    return loss[0], recon[0], kld[0]


def _reference(mu, logvar, rc, rs, tc, ts, batch_size,
               KLD_coef, reconstruction_coef, clamp, clamp_threshold):
    rc = rc.astype(jnp.float32); tc = tc.astype(jnp.float32)
    rs = rs.astype(jnp.float32); ts = ts.astype(jnp.float32)
    col_err = jnp.mean(jnp.abs((tc - rc) ** 2))
    sil_err = jnp.mean(jnp.abs((ts - rs) ** 2))
    recon = (col_err + sil_err) / 2.0
    kld = -0.5 * jnp.mean(1.0 + logvar - mu ** 2 - jnp.exp(logvar))
    loss = reconstruction_coef * recon + KLD_coef * kld
    loss = loss / batch_size
    if clamp:
        loss = jnp.clip(loss, -clamp_threshold, clamp_threshold)
    return loss, recon, kld


if __name__ == "__main__":
    key = jax.random.PRNGKey(0)
    k = jax.random.split(key, 6)

    # Small shapes consistent with the module's forward (NCVHW renders):
    B, C, V, H, W, Z = 2, 3, 2, 16, 16, 32
    mu = jax.random.normal(k[0], (B, Z), jnp.float32)
    logvar = jax.random.normal(k[1], (B, Z), jnp.float32) * 0.1
    rendered_images = jax.random.uniform(k[2], (B, C, V, H, W), jnp.float32)
    target_renders = jax.random.uniform(k[3], (B, C, V, H, W), jnp.float32)
    rendered_silhouttes = jax.random.uniform(k[4], (B, 1, V, H, W), jnp.float32)
    target_silhouttes = jax.random.uniform(k[5], (B, 1, V, H, W), jnp.float32)

    ref_loss, ref_recon, ref_kld = _reference(
        mu, logvar, rendered_images, rendered_silhouttes,
        target_renders, target_silhouttes, B, 1.0, 1.0, True, 100.0)

    # 1) default tiling (single grid step for these small shapes)
    out_big = vae_loss(
        mu, logvar, rendered_images, rendered_silhouttes,
        target_renders, target_silhouttes, batch_size=B,
        KLD_coef=1.0, reconstruction_coef=1.0,
        clamp=True, clamp_threshold=100.0)
    # 2) forced small tiles -> multi-step grid, exercises the accumulator +
    #    zero-padding path
    out_small = vae_loss(
        mu, logvar, rendered_images, rendered_silhouttes,
        target_renders, target_silhouttes, batch_size=B,
        KLD_coef=1.0, reconstruction_coef=1.0,
        clamp=True, clamp_threshold=100.0, max_block_rows=8)
    jax.block_until_ready((out_big, out_small))

    for loss, recon, kld in (out_big, out_small):
        assert np.allclose(np.asarray(loss), np.asarray(ref_loss), rtol=1e-5, atol=1e-6)
        assert np.allclose(np.asarray(recon), np.asarray(ref_recon), rtol=1e-5, atol=1e-6)
        assert np.allclose(np.asarray(kld), np.asarray(ref_kld), rtol=1e-5, atol=1e-6)

    print("KERNEL_OK")
</pallas_src>

<mosaic_0001>
module attributes {stable_mosaic.version = 11 : i64} {
  func.func @_vae_loss_kernel(%arg0: i32, %arg1: memref<2x32xf32, #tpu.memory_space<vmem>>, %arg2: memref<2x32xf32, #tpu.memory_space<vmem>>, %arg3: memref<24x128xf32, #tpu.memory_space<vmem>>, %arg4: memref<24x128xf32, #tpu.memory_space<vmem>>, %arg5: memref<8x128xf32, #tpu.memory_space<vmem>>, %arg6: memref<8x128xf32, #tpu.memory_space<vmem>>, %arg7: memref<1xf32, #tpu.memory_space<smem>>, %arg8: memref<1xf32, #tpu.memory_space<smem>>, %arg9: memref<1xf32, #tpu.memory_space<smem>>, %arg10: memref<1x128xf32, #tpu.memory_space<vmem>>, %arg11: memref<1x128xf32, #tpu.memory_space<vmem>>) attributes {dimension_semantics = [#tpu.dimension_semantics<arbitrary>], iteration_bounds = array<i64: 1>, scalar_prefetch = 0 : i64, scratch_operands = 2 : i64, tpu.core_type = #tpu.core_type<tc>, window_params = [{pipeline_mode = #tpu.pipeline_mode<synchronous>, transform_indices = @transform_0, window_bounds = array<i64: 2, 32>}, {pipeline_mode = #tpu.pipeline_mode<synchronous>, transform_indices = @transform_1, window_bounds = array<i64: 2, 32>}, {transform_indices = @transform_2, window_bounds = array<i64: 24, 128>}, {transform_indices = @transform_3, window_bounds = array<i64: 24, 128>}, {transform_indices = @transform_4, window_bounds = array<i64: 8, 128>}, {transform_indices = @transform_5, window_bounds = array<i64: 8, 128>}, {transform_indices = @transform_6, window_bounds = array<i64: 1>}, {transform_indices = @transform_7, window_bounds = array<i64: 1>}, {transform_indices = @transform_8, window_bounds = array<i64: 1>}]} {
    %c0_i32 = arith.constant 0 : i32
    %0 = arith.cmpi eq, %arg0, %c0_i32 : i32
    %1 = arith.extui %0 : i1 to i32
    %c0_i32_0 = arith.constant 0 : i32
    %2 = arith.cmpi ne, %1, %c0_i32_0 : i32
    scf.if %2 {
      %cst_19 = arith.constant 0.000000e+00 : f32
      %24 = vector.broadcast %cst_19 : f32 to vector<1x128xf32>
      %c0_20 = arith.constant 0 : index
      %c0_21 = arith.constant 0 : index
      %25 = vector.load %arg10[%c0_20, %c0_21] : memref<1x128xf32, #tpu.memory_space<vmem>>, vector<1x128xf32>
      tpu.vector_store %arg10[%c0_20, %c0_21], %24 {strides = array<i32>} : memref<1x128xf32, #tpu.memory_space<vmem>>, vector<1x128xf32>,
      %cst_22 = arith.constant 0.000000e+00 : f32
      %26 = vector.broadcast %cst_22 : f32 to vector<1x128xf32>
      %c0_23 = arith.constant 0 : index
      %c0_24 = arith.constant 0 : index
      %27 = vector.load %arg11[%c0_23, %c0_24] : memref<1x128xf32, #tpu.memory_space<vmem>>, vector<1x128xf32>
      tpu.vector_store %arg11[%c0_23, %c0_24], %26 {strides = array<i32>} : memref<1x128xf32, #tpu.memory_space<vmem>>, vector<1x128xf32>,
    } else {
    }
    %c0 = arith.constant 0 : index
    %c0_1 = arith.constant 0 : index
    %3 = vector.load %arg4[%c0, %c0_1] : memref<24x128xf32, #tpu.memory_space<vmem>>, vector<24x128xf32>
    %c0_2 = arith.constant 0 : index
    %c0_3 = arith.constant 0 : index
    %4 = vector.load %arg3[%c0_2, %c0_3] : memref<24x128xf32, #tpu.memory_space<vmem>>, vector<24x128xf32>
    %5 = arith.subf %3, %4 : vector<24x128xf32>
    %c0_4 = arith.constant 0 : index
    %c0_5 = arith.constant 0 : index
    %6 = vector.load %arg10[%c0_4, %c0_5] : memref<1x128xf32, #tpu.memory_space<vmem>>, vector<1x128xf32>
    %7 = arith.mulf %5, %5 : vector<24x128xf32>
    %cst = arith.constant dense<0.000000e+00> : vector<128xf32>
    %8 = vector.multi_reduction <add>, %7, %cst [0] : vector<24x128xf32> to vector<128xf32>
    %9 = vector.shape_cast %8 : vector<128xf32> to vector<1x128xf32>
    %10 = arith.addf %6, %9 : vector<1x128xf32>
    %c0_6 = arith.constant 0 : index
    %c0_7 = arith.constant 0 : index
    %11 = vector.load %arg10[%c0_6, %c0_7] : memref<1x128xf32, #tpu.memory_space<vmem>>, vector<1x128xf32>
    tpu.vector_store %arg10[%c0_6, %c0_7], %10 {strides = array<i32>} : memref<1x128xf32, #tpu.memory_space<vmem>>, vector<1x128xf32>,
    %c0_8 = arith.constant 0 : index
    %c0_9 = arith.constant 0 : index
    %12 = vector.load %arg6[%c0_8, %c0_9] : memref<8x128xf32, #tpu.memory_space<vmem>>, vector<8x128xf32>
    %c0_10 = arith.constant 0 : index
    %c0_11 = arith.constant 0 : index
    %13 = vector.load %arg5[%c0_10, %c0_11] : memref<8x128xf32, #tpu.memory_space<vmem>>, vector<8x128xf32>
    %14 = arith.subf %12, %13 : vector<8x128xf32>
    %c0_12 = arith.constant 0 : index
    %c0_13 = arith.constant 0 : index
    %15 = vector.load %arg11[%c0_12, %c0_13] : memref<1x128xf32, #tpu.memory_space<vmem>>, vector<1x128xf32>
    %16 = arith.mulf %14, %14 : vector<8x128xf32>
    %cst_14 = arith.constant dense<0.000000e+00> : vector<128xf32>
    %17 = vector.multi_reduction <add>, %16, %cst_14 [0] : vector<8x128xf32> to vector<128xf32>
    %18 = vector.shape_cast %17 : vector<128xf32> to vector<1x128xf32>
    %19 = arith.addf %15, %18 : vector<1x128xf32>
    %c0_15 = arith.constant 0 : index
    %c0_16 = arith.constant 0 : index
    %20 = vector.load %arg11[%c0_15, %c0_16] : memref<1x128xf32, #tpu.memory_space<vmem>>, vector<1x128xf32>
    tpu.vector_store %arg11[%c0_15, %c0_16], %19 {strides = array<i32>} : memref<1x128xf32, #tpu.memory_space<vmem>>, vector<1x128xf32>,
    %c0_i32_17 = arith.constant 0 : i32
    %21 = arith.cmpi eq, %arg0, %c0_i32_17 : i32
    %22 = arith.extui %21 : i1 to i32
    %c0_i32_18 = arith.constant 0 : i32
    %23 = arith.cmpi ne, %22, %c0_i32_18 : i32
    scf.if %23 {
      %c0_19 = arith.constant 0 : index
      %c0_20 = arith.constant 0 : index
      %24 = vector.load %arg10[%c0_19, %c0_20] : memref<1x128xf32, #tpu.memory_space<vmem>>, vector<1x128xf32>
      %25 = vector.shape_cast %24 : vector<1x128xf32> to vector<1x1x128xf32>
      %cst_21 = arith.constant dense<0.000000e+00> : vector<1xf32>
      %26 = vector.multi_reduction <add>, %25, %cst_21 [1, 2] : vector<1x1x128xf32> to vector<1xf32>
      %27 = vector.shape_cast %26 : vector<1xf32> to vector<1x1x1xf32>
      %28 = vector.extract %27[0, 0, 0] : f32 from vector<1x1x1xf32>
      %cst_22 = arith.constant 3.072000e+03 : f32
      %29 = arith.divf %28, %cst_22 : f32
      %c0_23 = arith.constant 0 : index
      %c0_24 = arith.constant 0 : index
      %30 = vector.load %arg11[%c0_23, %c0_24] : memref<1x128xf32, #tpu.memory_space<vmem>>, vector<1x128xf32>
      %31 = vector.shape_cast %30 : vector<1x128xf32> to vector<1x1x128xf32>
      %cst_25 = arith.constant dense<0.000000e+00> : vector<1xf32>
      %32 = vector.multi_reduction <add>, %31, %cst_25 [1, 2] : vector<1x1x128xf32> to vector<1xf32>
      %33 = vector.shape_cast %32 : vector<1xf32> to vector<1x1x1xf32>
      %34 = vector.extract %33[0, 0, 0] : f32 from vector<1x1x1xf32>
      %cst_26 = arith.constant 1.024000e+03 : f32
      %35 = arith.divf %34, %cst_26 : f32
      %36 = arith.addf %29, %35 : f32
      %cst_27 = arith.constant 5.000000e-01 : f32
      %37 = arith.mulf %36, %cst_27 : f32
      %c0_28 = arith.constant 0 : index
      %c0_29 = arith.constant 0 : index
      %38 = vector.load %arg1[%c0_28, %c0_29] : memref<2x32xf32, #tpu.memory_space<vmem>>, vector<2x32xf32>
      %c0_30 = arith.constant 0 : index
      %c0_31 = arith.constant 0 : index
      %39 = vector.load %arg2[%c0_30, %c0_31] : memref<2x32xf32, #tpu.memory_space<vmem>>, vector<2x32xf32>
      %cst_32 = arith.constant 1.000000e+00 : f32
      %40 = vector.broadcast %cst_32 : f32 to vector<2x32xf32>
      %41 = arith.addf %40, %39 : vector<2x32xf32>
      %42 = arith.mulf %38, %38 : vector<2x32xf32>
      %43 = arith.subf %41, %42 : vector<2x32xf32>
      %44 = math.exp %39 : vector<2x32xf32>
      %45 = arith.subf %43, %44 : vector<2x32xf32>
      %46 = vector.shape_cast %45 : vector<2x32xf32> to vector<1x2x32xf32>
      %cst_33 = arith.constant dense<0.000000e+00> : vector<1xf32>
      %47 = vector.multi_reduction <add>, %46, %cst_33 [1, 2] : vector<1x2x32xf32> to vector<1xf32>
      %48 = vector.shape_cast %47 : vector<1xf32> to vector<1x1x1xf32>
      %49 = vector.extract %48[0, 0, 0] : f32 from vector<1x1x1xf32>
      %cst_34 = arith.constant 6.400000e+01 : f32
      %50 = arith.divf %49, %cst_34 : f32
      %cst_35 = arith.constant -5.000000e-01 : f32
      %51 = arith.mulf %cst_35, %50 : f32
      %cst_36 = arith.constant 1.000000e+00 : f32
      %52 = arith.mulf %cst_36, %37 : f32
      %cst_37 = arith.constant 1.000000e+00 : f32
      %53 = arith.mulf %cst_37, %51 : f32
      %54 = arith.addf %52, %53 : f32
      %cst_38 = arith.constant 2.000000e+00 : f32
      %55 = arith.divf %54, %cst_38 : f32
      %cst_39 = arith.constant -1.000000e+02 : f32
      %cst_40 = arith.constant 1.000000e+02 : f32
      %56 = arith.maximumf %cst_39, %55 : f32
      %57 = arith.minimumf %cst_40, %56 : f32
      %c0_41 = arith.constant 0 : index
      %58 = memref.load %arg7[%c0_41] : memref<1xf32, #tpu.memory_space<smem>>
      memref.store %57, %arg7[%c0_41] : memref<1xf32, #tpu.memory_space<smem>>
      %c0_42 = arith.constant 0 : index
      %59 = memref.load %arg8[%c0_42] : memref<1xf32, #tpu.memory_space<smem>>
      memref.store %37, %arg8[%c0_42] : memref<1xf32, #tpu.memory_space<smem>>
      %c0_43 = arith.constant 0 : index
      %60 = memref.load %arg9[%c0_43] : memref<1xf32, #tpu.memory_space<smem>>
      memref.store %51, %arg9[%c0_43] : memref<1xf32, #tpu.memory_space<smem>>
    } else {
    }
    return
  }
  func.func @transform_0(%arg0: i32) -> (i32, i32) {
    %c0_i32 = arith.constant 0 : i32
    %c0_i32_0 = arith.constant 0 : i32
    %c0_i32_1 = arith.constant 0 : i32
    return %c0_i32, %c0_i32_0 : i32, i32
  }
  func.func @transform_1(%arg0: i32) -> (i32, i32) {
    %c0_i32 = arith.constant 0 : i32
    %c0_i32_0 = arith.constant 0 : i32
    %c0_i32_1 = arith.constant 0 : i32
    return %c0_i32, %c0_i32_0 : i32, i32
  }
  func.func @transform_2(%arg0: i32) -> (i32, i32) {
    %c0_i32 = arith.constant 0 : i32
    %c0_i32_0 = arith.constant 0 : i32
    return %arg0, %c0_i32 : i32, i32
  }
  func.func @transform_3(%arg0: i32) -> (i32, i32) {
    %c0_i32 = arith.constant 0 : i32
    %c0_i32_0 = arith.constant 0 : i32
    return %arg0, %c0_i32 : i32, i32
  }
  func.func @transform_4(%arg0: i32) -> (i32, i32) {
    %c0_i32 = arith.constant 0 : i32
    %c0_i32_0 = arith.constant 0 : i32
    return %arg0, %c0_i32 : i32, i32
  }
  func.func @transform_5(%arg0: i32) -> (i32, i32) {
    %c0_i32 = arith.constant 0 : i32
    %c0_i32_0 = arith.constant 0 : i32
    return %arg0, %c0_i32 : i32, i32
  }
  func.func @transform_6(%arg0: i32) -> i32 {
    %c0_i32 = arith.constant 0 : i32
    %c0_i32_0 = arith.constant 0 : i32
    return %c0_i32 : i32
  }
  func.func @transform_7(%arg0: i32) -> i32 {
    %c0_i32 = arith.constant 0 : i32
    %c0_i32_0 = arith.constant 0 : i32
    return %c0_i32 : i32
  }
  func.func @transform_8(%arg0: i32) -> i32 {
    %c0_i32 = arith.constant 0 : i32
    %c0_i32_0 = arith.constant 0 : i32
    return %c0_i32 : i32
  }
}

</mosaic_0001>

<bundles_post_ra>
// kernel: tpu_custom_call.1
= control target key start
LH: loop header
LB: loop body
LE: loop exit
PB: predicated region body
PF: predicated region fallthrough
CT: control target
= control target key end

     0   :  { %14 = vsyncpa [#allocation5], 0  ;;  %s480_s0 = inlined_call_operand.hbm [shape: f32[2,32], index: 0, kind: input, shape index: {}]   ;;  %s481_s1 = inlined_call_operand.hbm [shape: f32[2,32], index: 1, kind: input, shape index: {}]   ;;  %s482_s2 = inlined_call_operand.hbm [shape: f32[24,128], index: 2, kind: input, shape index: {}]   ;;  %s483_s3 = inlined_call_operand.hbm [shape: f32[24,128], index: 3, kind: input, shape index: {}]   ;;  %s484_s4 = inlined_call_operand.hbm [shape: f32[8,128], index: 4, kind: input, shape index: {}]   ;;  %s485_s5 = inlined_call_operand.vmem [shape: f32[8,128], index: 5, kind: input, shape index: {}]   ;;  %s486_s6 = inlined_call_operand.hbm [shape: f32[1], index: 6, kind: output, shape index: {0}]   ;;  %s487_s7 = inlined_call_operand.hbm [shape: f32[1], index: 7, kind: output, shape index: {1}]   ;;  %s488_s8 = inlined_call_operand.hbm [shape: f32[1], index: 8, kind: output, shape index: {2}]  }
   0x1   :  { %15 = vsyncpa [#allocation8], 0 }
   0x2   :  { %16 = vsyncpa [#allocation11], 0 }
   0x3   :  { %17 = vsyncpa [#allocation6], 0 }
   0x4   :  { %18 = vsyncpa [#allocation15], 0  ;;  %s395_s27 = smov [#allocation7]  }
   0x5   :  { %s35_s28 = sshll.u32 %s395_s27, 4  ;;  %s36_s28 = int_to_ptr.vmem [resolvable:$true] %s35_s28 }
   0x6   :  { %s269_s29 = scalar_lea.vmem %s36_s28, 32  ;;  %p274_p1 = scmp.lt.s32.totalorder %s36_s28, %s36_s28 }
   0x7   :  { %p270_p0 = scmp.ne.s32.totalorder %s36_s28, %s269_s29  ;;  %p275_p2 = scmp.lt.s32.totalorder %s269_s29, %s269_s29 }
   0x9   :  { %p276_p3 = por %p275_p2, %p274_p1 }
   0xb   :  { %p277_p4 = pnand %p276_p3, %p270_p0 }
   0xd   :  { %280 = shalt.err (!%p277_p4)
}
   0xe   :  { %38 = dma.hbm_to_vmem [thread:$0]  %s481_s1, 32, %s36_s28, [#allocation8]  }
   0xf   :  { %s396_s10 = smov [#allocation10]   ;;  %s397_s12 = smov [#allocation4]  }
  0x10   :  { %s56_s11 = sshll.u32 %s396_s10, 4  ;;  %s25_s13 = sshll.u32 %s397_s12, 4  ;;  %s57_s11 = int_to_ptr.vmem [resolvable:$true] %s56_s11  ;;  %s26_s13 = int_to_ptr.vmem [resolvable:$true] %s25_s13 }
  0x11   :  { %s289_s14 = scalar_lea.vmem %s57_s11, 384  ;;  %p294_p6 = scmp.lt.s32.totalorder %s57_s11, %s57_s11 }
  0x12   :  { %p290_p5 = scmp.ne.s32.totalorder %s57_s11, %s289_s14  ;;  %p295_p7 = scmp.lt.s32.totalorder %s289_s14, %s289_s14 }
  0x14   :  { %p296_p8 = por %p295_p7, %p294_p6 }
  0x16   :  { %p297_p9 = pnand %p296_p8, %p290_p5 }
  0x18   :  { %300 = shalt.err (!%p297_p9)
}
  0x19   :  { %s398_s15 = smov 128   ;;  %s399_s16 = smov 8  }
  0x1a   :  { %62 = dma.hbm_to_vmem [thread:$0]  %s483_s3, 384, %s57_s11, [#allocation11], %s398_s15, %s398_s15, %s399_s16  }
  0x1b   :  { %s309_s1 = scalar_lea.vmem %s26_s13, 32  ;;  %p314_p11 = scmp.lt.s32.totalorder %s26_s13, %s26_s13 }
  0x1c   :  { %p310_p10 = scmp.ne.s32.totalorder %s26_s13, %s309_s1  ;;  %p315_p12 = scmp.lt.s32.totalorder %s309_s1, %s309_s1 }
  0x1e   :  { %p316_p13 = por %p315_p12, %p314_p11 }
  0x20   :  { %p317_p0 = pnand %p316_p13, %p310_p10 }
  0x22   :  { %320 = shalt.err (!%p317_p0)
}
  0x23   :  { %28 = dma.hbm_to_vmem [thread:$0]  %s480_s0, 32, %s26_s13, [#allocation5]  }
  0x24   :  { %s400_s21 = smov [#allocation9]   ;;  %s401_s23 = smov [#allocation12]  }
  0x25   :  { %s44_s22 = sshll.u32 %s400_s21, 4  ;;  %s69_s24 = sshll.u32 %s401_s23, 4  ;;  %s45_s22 = int_to_ptr.vmem [resolvable:$true] %s44_s22  ;;  %s70_s24 = int_to_ptr.vmem [resolvable:$true] %s69_s24 }
  0x26   :  { %s329_s25 = scalar_lea.vmem %s45_s22, 384  ;;  %p334_p2 = scmp.lt.s32.totalorder %s45_s22, %s45_s22 }
  0x27   :  { %p330_p1 = scmp.ne.s32.totalorder %s45_s22, %s329_s25  ;;  %p335_p3 = scmp.lt.s32.totalorder %s329_s25, %s329_s25 }
  0x29   :  { %p336_p4 = por %p335_p3, %p334_p2 }
  0x2b   :  { %p337_p5 = pnand %p336_p4, %p330_p1 }
  0x2d   :  { %340 = shalt.err (!%p337_p5)
}
  0x2e   :  { %50 = dma.hbm_to_vmem [thread:$0]  %s482_s2, 384, %s45_s22, [#allocation8], %s398_s15, %s398_s15, %s399_s16  }
  0x2f   :  { %s349_s27 = scalar_lea.vmem %s70_s24, 128  ;;  %p354_p7 = scmp.lt.s32.totalorder %s70_s24, %s70_s24 }
  0x30   :  { %p350_p6 = scmp.ne.s32.totalorder %s70_s24, %s349_s27  ;;  %p355_p8 = scmp.lt.s32.totalorder %s349_s27, %s349_s27 }
  0x32   :  { %p356_p9 = por %p355_p8, %p354_p7 }
  0x34   :  { %p357_p10 = pnand %p356_p9, %p350_p6 }
  0x36   :  { %360 = shalt.err (!%p357_p10)
}
  0x37   :  { %72 = dma.hbm_to_vmem [thread:$0]  %s484_s4, 128, %s70_s24, [#allocation11]  }
  0x38   :  { %385 = dma.done.wait [#allocation5], 32  }
  0x39   :  { %386 = vsyncadd [#allocation5], 4294967264 }
  0x3a   :  { %387 = dma.done.wait [#allocation8], 416  }
  0x3b   :  { %388 = vsyncadd [#allocation8], 4294966880 }
  0x3c   :  { %389 = dma.done.wait [#allocation11], 512  }
  0x3d   :  { %390 = vsyncadd [#allocation11], 4294966784  ;;  %v402_v0 = vmov 0.0   ;;  %v167_v1 = vld [vmem:[#allocation7] sm:$0x3]  ;;  %v97_v4 = vld [vmem:[#allocation10 + $0x8] sm:$0xff] }
  0x3e   :  { %94 = vst [vmem:[#allocation2] sm:$0x1] %v402_v0  ;;  %95 = vst [vmem:[#allocation3] sm:$0x1] %v402_v0  ;;  %v96_v2 = vld [vmem:[#allocation10] sm:$0xff]  ;;  %v98_v5 = vld [vmem:[#allocation10 + $0x10] sm:$0xff] }
  0x3f   :  { %v171_v3 = vmul.f32 1.442695, %v167_v1  ;;  %v99_v6 = vld [vmem:[#allocation9] sm:$0xff]  ;;  %v100_v7 = vld [vmem:[#allocation9 + $0x8] sm:$0xff]  ;;  %v101_v8 = vld [vmem:[#allocation9 + $0x10] sm:$0xff]  ;;  %v168_v22 = vadd.f32 1.0, %v167_v1 }
  0x40   :  { %v102_v9 = vsub.f32 %v96_v2, %v99_v6  ;;  %v103_v10 = vsub.f32 %v97_v4, %v100_v7  ;;  %v104_v11 = vsub.f32 %v98_v5, %v101_v8  ;;  %v119_v12 = vld [vmem:[%s485_s5] sm:$0xff]  ;;  %v120_v13 = vld [vmem:[#allocation12] sm:$0xff]  ;;  %vm174_vm0 = vcmask 254976   ;;  %s403_s17 = smov [#allocation14]   ;;  %s404_s19 = smov -100.0  }
  0x41   :  { %259 = vpow2.f32 %v171_v3  ;;  %v121_v15 = vsub.f32 %v119_v12, %v120_v13  ;;  %v166_v18 = vld [vmem:[#allocation4] sm:$0x3]  ;;  %vm136_vm1 = vcmask 1040384   ;;  %s405_s21 = smov 100.0   ;;  %s406_s23 = smov [#allocation13]  }
  0x42   :  { %v106_v14 = vmul.f32 %v102_v9, %v102_v9  ;;  %v107_v16 = vmul.f32 %v103_v10, %v103_v10  ;;  %v108_v17 = vmul.f32 %v104_v11, %v104_v11  ;;  %v169_v23 = vmul.f32 %v166_v18, %v166_v18  ;;  %s407_s3 = smov [#allocation16]  }
  0x43   :  { %v123_v19 = vmul.f32 %v121_v15, %v121_v15 }
  0x44   :  { %v109_v20 = vadd.f32 %v107_v16, %v106_v14  ;;  %v170_v28 = vsub.f32 %v168_v22, %v169_v23 }
  0x45   :  { %v124_v21 = vrot.slane %v123_v19, 4  ;;  %v122_v36 = vld [vmem:[#allocation3] sm:$0x1]  ;;  %v105_v40 = vld [vmem:[#allocation2] sm:$0x1] }
  0x46   :  { %v110_v24 = vadd.f32 %v109_v20, %v108_v17 }
  0x47   :  { %v125_v25 = vadd.f32 %v124_v21, %v123_v19 }
  0x48   :  { %v111_v26 = vrot.slane %v110_v24, 4 }
  0x49   :  { %v126_v27 = vrot.slane %v125_v25, 2 }
  0x4a   :  { %v112_v29 = vadd.f32 %v111_v26, %v110_v24 }
  0x4b   :  { %v127_v30 = vadd.f32 %v126_v27, %v125_v25 }
  0x4c   :  { %v113_v31 = vrot.slane %v112_v29, 2 }
  0x4d   :  { %v128_v33 = vrot.slane %v127_v30, 1 }
  0x4e   :  { %v260_v32 = vpop.eup %259  ;;  %v114_v35 = vadd.f32 %v113_v31, %v112_v29 }
  0x4f   :  { %v173_v34 = vsub.f32 %v170_v28, %v260_v32  ;;  %v129_v37 = vadd.f32 %v128_v33, %v127_v30 }
  0x50   :  { %v115_v39 = vrot.slane %v114_v35, 1 }
  0x51   :  { %v175_v38 = vsel %vm174_vm0, %v173_v34, 0.0  ;;  %v130_v41 = vadd.f32 %v129_v37, %v122_v36 }
  0x52   :  { %176 = vadd.xlane.f32.xlu1 %v175_v38  ;;  %v116_v42 = vadd.f32 %v115_v39, %v114_v35 }
  0x53   :  { %131 = vst [vmem:[#allocation3] sm:$0x1] %v130_v41 }
  0x54   :  { %v117_v43 = vadd.f32 %v116_v42, %v105_v40 }
  0x56   :  { %118 = vst [vmem:[#allocation2] sm:$0x1] %v117_v43 }
  0x5a   :  { %v150_v45 = vld [vmem:[#allocation3] sm:$0x1] }
  0x5b   :  { %v151_v47 = vsel %vm136_vm1, %v150_v45, 0.0 }
  0x5d   :  { %v135_v44 = vld [vmem:[#allocation2] sm:$0x1] }
  0x5e   :  { %v137_v46 = vsel %vm136_vm1, %v135_v44, 0.0 }
  0x5f   :  { %138 = vadd.xlane.f32.xlu0 %v137_v46 }
  0x63   :  { %152 = vadd.xlane.f32.xlu0 %v151_v47 }
  0xdb   :  { %v177_v48 = vpop.xlane.xlu1 %176 }
  0xdc   :  { %v178_v49 = vrot.slane %v177_v48, 4 }
  0xde   :  { %v179_v50 = vadd.f32 %v178_v49, %v177_v48 }
  0xe0   :  { %v180_v54 = vrot.slane %v179_v50, 2 }
  0xe2   :  { %v181_v60 = vadd.f32 %v180_v54, %v179_v50 }
  0xe4   :  { %v182_v1 = vrot.slane %v181_v60, 1 }
  0xe6   :  { %v183_v4 = vadd.f32 %v182_v1, %v181_v60 }
  0xe8   :  { %v139_v51 = vpop.xlane.xlu0 %138 }
  0xe9   :  { %v140_v52 = vrot.slane %v139_v51, 4 }
  0xeb   :  { %v141_v53 = vadd.f32 %v140_v52, %v139_v51 }
  0xec   :  { %v153_v55 = vpop.xlane.xlu0 %152 }
  0xed   :  { %v142_v56 = vrot.slane %v141_v53, 2  ;;  %v154_v57 = vrot.slane %v153_v55, 4 }
  0xef   :  { %v155_v58 = vadd.f32 %v154_v57, %v153_v55  ;;  %v143_v59 = vadd.f32 %v142_v56, %v141_v53 }
  0xf1   :  { %v156_v61 = vrot.slane %v155_v58, 2  ;;  %v144_v62 = vrot.slane %v143_v59, 1 }
  0xf3   :  { %v157_v63 = vadd.f32 %v156_v61, %v155_v58  ;;  %v145_v0 = vadd.f32 %v144_v62, %v143_v59 }
  0xf5   :  { %240 = vpush %v145_v0  ;;  %v158_v2 = vrot.slane %v157_v63, 1 }
  0xf7   :  { %v159_v3 = vadd.f32 %v158_v2, %v157_v63 }
  0xf9   :  { %242 = vpush %v159_v3 }
  0xfa   :  { %244 = vpush %v183_v4 }
 0x126   :  { %s241_s5 = spop %240 }
 0x127   :  { %s149_s29 = smul.f32 0.00032552084, %s241_s5 }
 0x12a   :  { %s243_s30 = spop %242 }
 0x12b   :  { %s163_s9 = smul.f32 0.0009765625, %s243_s30  ;;  %s245_s10 = spop %244 }
 0x12c   :  { %s187_s11 = smul.f32 0.015625, %s245_s10 }
 0x12d   :  { %s164_s12 = sadd.f32 %s163_s9, %s149_s29 }
 0x12e   :  { %s188_s13 = smul.f32 -0.5, %s187_s11 }
 0x12f   :  { %s165_s14 = smul.f32 0.5, %s164_s12 }
 0x130   :  { %200 = sst [smem:[#allocation16]] %s188_s13 }
 0x131   :  { %s189_s15 = sadd.f32 %s188_s13, %s165_s14 }
 0x132   :  { %198 = sst [smem:[#allocation14]] %s165_s14 }
 0x133   :  { %s192_s16 = smul.f32 0.5, %s189_s15 }
 0x134   :  { %216 = dma.smem_to_hbm %s403_s17, 16, %s487_s7, [#allocation15]  }
 0x135   :  { %s193_s20 = smax.f32 %s404_s19, %s192_s16 }
 0x136   :  { %s194_s22 = smin.f32 %s405_s21, %s193_s20 }
 0x137   :  { %196 = sst [smem:[#allocation13]] %s194_s22 }
 0x138   :  { %208 = dma.smem_to_hbm %s406_s23, 16, %s486_s6, [#allocation6]  }
 0x139   :  { %224 = dma.smem_to_hbm %s407_s3, 16, %s488_s8, [#allocation15]  }
 0x13a   :  { %391 = dma.done.wait [#allocation6], 16  }
 0x13b   :  { %392 = vsyncadd [#allocation6], 4294967280 }
 0x13c   :  { %393 = dma.done.wait [#allocation15], 32  }
 0x13d   :  { %394 = vsyncadd [#allocation15], 4294967264 }
 0x13e   :  { %234 = sfence }
 0x13f   :  { %235 = vsyncpa [#allocation5], 1 }
 0x140   :  { %236 = vsyncpa [#allocation8], 1 }
 0x141   :  { %237 = vsyncpa [#allocation11], 1 }
 0x142   :  { %238 = vsyncpa [#allocation6], 1 }
 0x143   :  { %239 = vsyncpa [#allocation15], 1 }

</bundles_post_ra>
